<compile_context>
chip_gen: v7x
topology: tpu7x:2x2x1
jax: 0.10.0
libtpu: 0.0.40
codegen_flags: <defaults>
</compile_context>

<pallas_src>
import jax
import jax.numpy as jnp
from jax import lax
from jax.experimental import pallas as pl
from jax.experimental.pallas import tpu as pltpu


def _conv_prelu_kernel(p_ref, w_ref, b_ref, alpha_ref, o_ref):
    # p_ref:     [T, K]    im2col patch tile (K = 9*C)
    # w_ref:     [K, OC]   weights, OC columns pre-permuted to (i, j, c_out)
    # b_ref:     [1, OC]   bias, same column permutation (f32)
    # alpha_ref: [1]       PReLU slope (SMEM scalar, f32)
    # o_ref:     [T, OC]
    acc = jnp.dot(p_ref[...], w_ref[...], preferred_element_type=jnp.float32)
    acc = acc + b_ref[...]                       # broadcast [1, OC] over [T, OC]
    alpha = alpha_ref[0]                         # scalar read from SMEM
    o_ref[...] = jnp.where(acc >= 0, acc, alpha * acc).astype(o_ref.dtype)


def _pick_tile_rows(rows, max_tile, min_steps):
    """Largest T dividing `rows`, T <= max_tile, T % 8 == 0 (or T == rows),
    aiming for at least `min_steps` grid steps when achievable."""
    target = max(1, min(max_tile, rows // max(1, min_steps)))
    for cand in range(target, 0, -1):
        if rows % cand == 0 and (cand % 8 == 0 or cand == rows):
            return cand
    return rows


def pixel_shuffler_block(x_nchw, weight, bias, alpha, upscale_factor=2, *,
                         max_tile_rows=256, min_grid_steps=2,
                         compute_dtype=jnp.float32, out_dtype=jnp.float32,
                         channels_last=False):
    """x_nchw: [N, C, H, W]; weight: [256, C, 3, 3] (OIHW); bias: [256]; alpha scalar.

    Returns [N, 256 // r^2, H*r, W*r] (NCHW, matching the PyTorch module), or
    NHWC if channels_last=True (lane-dense, avoids the sub-128-lane transpose).
    """
    N, C, H, W = x_nchw.shape
    OC = weight.shape[0]                  # 256
    r = upscale_factor
    oc_out = OC // (r * r)
    HW = H * W
    R = N * HW                            # flattened row axis (N merged into HW)
    K = 9 * C

    # ---- im2col in the wrapper (single-matmul kernel, no in-kernel relayouts).
    #      Tiny at these sizes; see scale-up NOTE at top of file.
    x_nhwc = jnp.transpose(x_nchw, (0, 2, 3, 1)).astype(compute_dtype)
    x_pad = jnp.pad(x_nhwc, ((0, 0), (1, 1), (1, 1), (0, 0)))
    patches = jnp.concatenate(
        [x_pad[:, kh:kh + H, kw:kw + W, :] for kh in range(3) for kw in range(3)],
        axis=-1).reshape(R, K)            # column index = (kh*3 + kw)*C + c

    # ---- weight OIHW -> [K, OC]; then permute OC columns from (c_out, i, j)
    #      order to (i, j, c_out) so the post-kernel pixel shuffle is cheap.
    w_k = jnp.transpose(weight, (2, 3, 1, 0)).reshape(K, OC)
    w_k = jnp.transpose(w_k.reshape(K, oc_out, r, r), (0, 2, 3, 1)).reshape(K, OC)
    w_k = w_k.astype(compute_dtype)
    b_k = jnp.transpose(bias.reshape(oc_out, r, r), (1, 2, 0)).reshape(1, OC)
    b_k = b_k.astype(jnp.float32)
    a_k = jnp.asarray(alpha, jnp.float32).reshape(1)

    # ---- Row tiling: as few / as large grid steps as possible, but keep at
    #      least `min_grid_steps` parallel steps so v7x's 2 TCs both get work.
    T = _pick_tile_rows(R, max_tile_rows, min_grid_steps)
    grid = (R // T,)

    y_flat = pl.pallas_call(
        _conv_prelu_kernel,
        out_shape=jax.ShapeDtypeStruct((R, OC), out_dtype),
        grid_spec=pltpu.PrefetchScalarGridSpec(
            num_scalar_prefetch=0,
            grid=grid,
            in_specs=[
                pl.BlockSpec((T, K), lambda t: (t, 0)),
                pl.BlockSpec((K, OC), lambda t: (0, 0)),     # resident weights
                pl.BlockSpec((1, OC), lambda t: (0, 0)),     # resident bias
                pl.BlockSpec(memory_space=pltpu.MemorySpace.SMEM),  # alpha scalar
            ],
            out_specs=pl.BlockSpec((T, OC), lambda t: (t, 0)),
        ),
        compiler_params=pltpu.CompilerParams(
            dimension_semantics=("parallel",)),
        # Per-step blocks are <= ~0.3 MB even at T=256, well under the default
        # scoped VMEM on v5e/v6e/v7x; re-derive T + vmem_limit_bytes at scale.
    )(patches, w_k, b_k, a_k)

    # ---- PixelShuffle: columns are already (i, j, c_out) ordered.
    y = y_flat.reshape(N, H, W, r, r, oc_out)              # (n, h, w, i, j, c)
    if channels_last:
        # Lane-dense NHWC return: (n, h, i, w, j, c) -> (N, H*r, W*r, c)
        y = jnp.transpose(y, (0, 1, 3, 2, 4, 5))
        return y.reshape(N, H * r, W * r, oc_out)
    y = jnp.transpose(y, (0, 5, 1, 3, 2, 4))               # (n, c, h, i, w, j)
    return y.reshape(N, oc_out, H * r, W * r)


def _reference(x_nchw, weight, bias, alpha, upscale_factor=2):
    """Pure-JAX reference (conv -> pixel shuffle -> prelu) for validation."""
    conv = lax.conv_general_dilated(
        x_nchw, weight, window_strides=(1, 1), padding=((1, 1), (1, 1)),
        dimension_numbers=("NCHW", "OIHW", "NCHW"))
    conv = conv + bias.reshape(1, -1, 1, 1)
    r = upscale_factor
    N, OC, H, W = conv.shape
    oc_out = OC // (r * r)
    y = conv.reshape(N, oc_out, r, r, H, W)
    y = jnp.transpose(y, (0, 1, 4, 2, 5, 3)).reshape(N, oc_out, H * r, W * r)
    return jnp.where(y >= 0, y, alpha * y)


if __name__ == "__main__":
    key = jax.random.PRNGKey(0)
    k_x, k_w, k_b = jax.random.split(key, 3)

    N, C, H, W = 2, 4, 16, 16
    OC = 256
    upscale = 2

    x = jax.random.normal(k_x, (N, C, H, W), dtype=jnp.float32)
    # Deterministic synthetic parameters (shapes from nn.Conv2d(C, 256, 3, padding=1)).
    weight = jax.random.normal(k_w, (OC, C, 3, 3), dtype=jnp.float32) * 0.05
    bias = jax.random.normal(k_b, (OC,), dtype=jnp.float32) * 0.05
    alpha = jnp.float32(0.25)  # nn.PReLU() default init

    fn = jax.jit(lambda xx, ww, bb, aa: pixel_shuffler_block(xx, ww, bb, aa, upscale))
    out = jax.block_until_ready(fn(x, weight, bias, alpha))
    ref = jax.block_until_ready(_reference(x, weight, bias, alpha, upscale))

    assert out.shape == (N, OC // (upscale * upscale), H * upscale, W * upscale), out.shape
    assert jnp.allclose(out, ref, atol=1e-4, rtol=1e-4), float(jnp.max(jnp.abs(out - ref)))

    print("KERNEL_OK")
</pallas_src>

<mosaic_0001>
module attributes {stable_mosaic.version = 11 : i64} {
  func.func @_conv_prelu_kernel(%arg0: i32, %arg1: memref<256x36xf32, #tpu.memory_space<vmem>>, %arg2: memref<36x256xf32, #tpu.memory_space<vmem>>, %arg3: memref<1x256xf32, #tpu.memory_space<vmem>>, %arg4: memref<1xf32, #tpu.memory_space<smem>>, %arg5: memref<256x256xf32, #tpu.memory_space<vmem>>) attributes {dimension_semantics = [#tpu.dimension_semantics<parallel>], iteration_bounds = array<i64: 2>, scalar_prefetch = 0 : i64, scratch_operands = 0 : i64, tpu.core_type = #tpu.core_type<tc>, window_params = [{transform_indices = @transform_0, window_bounds = array<i64: 256, 36>}, {pipeline_mode = #tpu.pipeline_mode<synchronous>, transform_indices = @transform_1, window_bounds = array<i64: 36, 256>}, {pipeline_mode = #tpu.pipeline_mode<synchronous>, transform_indices = @transform_2, window_bounds = array<i64: 1, 256>}, {transform_indices = @transform_3, window_bounds = array<i64: 1>}, {transform_indices = @transform_4, window_bounds = array<i64: 256, 256>}]} {
    %c0 = arith.constant 0 : index
    %c0_0 = arith.constant 0 : index
    %0 = vector.load %arg1[%c0, %c0_0] : memref<256x36xf32, #tpu.memory_space<vmem>>, vector<256x36xf32>
    %c0_1 = arith.constant 0 : index
    %c0_2 = arith.constant 0 : index
    %1 = vector.load %arg2[%c0_1, %c0_2] : memref<36x256xf32, #tpu.memory_space<vmem>>, vector<36x256xf32>
    %cst = arith.constant dense<0.000000e+00> : vector<256x256xf32>
    %2 = tpu.matmul %0, %1, %cst {dimension_numbers = #tpu.dot_dimension_numbers<[1], [0], [0], [1], [0, 0, 1, 1], [], []>} : vector<256x36xf32>, vector<36x256xf32>, vector<256x256xf32> -> vector<256x256xf32>
    %c0_3 = arith.constant 0 : index
    %c0_4 = arith.constant 0 : index
    %3 = vector.load %arg3[%c0_3, %c0_4] : memref<1x256xf32, #tpu.memory_space<vmem>>, vector<1x256xf32>
    %4 = vector.broadcast %3 : vector<1x256xf32> to vector<256x256xf32>
    %5 = arith.addf %2, %4 : vector<256x256xf32>
    %c0_5 = arith.constant 0 : index
    %6 = memref.load %arg4[%c0_5] : memref<1xf32, #tpu.memory_space<smem>>
    %cst_6 = arith.constant 0.000000e+00 : f32
    %7 = vector.broadcast %cst_6 : f32 to vector<256x256xf32>
    %8 = arith.cmpf oge, %5, %7 : vector<256x256xf32>
    %9 = vector.broadcast %6 : f32 to vector<256x256xf32>
    %10 = arith.mulf %9, %5 : vector<256x256xf32>
    %11 = arith.select %8, %5, %10 : vector<256x256xi1>, vector<256x256xf32>
    %c0_7 = arith.constant 0 : index
    %c0_8 = arith.constant 0 : index
    %12 = vector.load %arg5[%c0_7, %c0_8] : memref<256x256xf32, #tpu.memory_space<vmem>>, vector<256x256xf32>
    tpu.vector_store %arg5[%c0_7, %c0_8], %11 {strides = array<i32>} : memref<256x256xf32, #tpu.memory_space<vmem>>, vector<256x256xf32>,
    return
  }
  func.func @transform_0(%arg0: i32) -> (i32, i32) {
    %c0_i32 = arith.constant 0 : i32
    %c0_i32_0 = arith.constant 0 : i32
    return %arg0, %c0_i32 : i32, i32
  }
  func.func @transform_1(%arg0: i32) -> (i32, i32) {
    %c0_i32 = arith.constant 0 : i32
    %c0_i32_0 = arith.constant 0 : i32
    %c0_i32_1 = arith.constant 0 : i32
    return %c0_i32, %c0_i32_0 : i32, i32
  }
  func.func @transform_2(%arg0: i32) -> (i32, i32) {
    %c0_i32 = arith.constant 0 : i32
    %c0_i32_0 = arith.constant 0 : i32
    %c0_i32_1 = arith.constant 0 : i32
    return %c0_i32, %c0_i32_0 : i32, i32
  }
  func.func @transform_3(%arg0: i32) -> i32 {
    %c0_i32 = arith.constant 0 : i32
    %c0_i32_0 = arith.constant 0 : i32
    return %c0_i32 : i32
  }
  func.func @transform_4(%arg0: i32) -> (i32, i32) {
    %c0_i32 = arith.constant 0 : i32
    %c0_i32_0 = arith.constant 0 : i32
    return %arg0, %c0_i32 : i32, i32
  }
}

</mosaic_0001>

<bundles_post_ra>
// kernel: _lambda_.1
= control target key start
LH: loop header
LB: loop body
LE: loop exit
PB: predicated region body
PF: predicated region fallthrough
CT: control target
= control target key end

     0   :  { %s1042_s17 = smov 0   ;;  %s1394_s0 = inlined_call_operand.vmem [shape: f32[512,36], index: 0, kind: input, shape index: {}]   ;;  %s1395_s1 = inlined_call_operand.vmem [shape: f32[36,256], index: 1, kind: input, shape index: {}]   ;;  %s1396_s2 = inlined_call_operand.vmem [shape: f32[1,256], index: 2, kind: input, shape index: {}]   ;;  %s1397_s3 = inlined_call_operand.<no memory space> [shape: f32[1], index: 3, kind: input, shape index: {}]   ;;  %s1398_s4 = inlined_call_operand.vmem [shape: f32[512,256], index: 4, kind: output, shape index: {}]  }
   0x1   :  { %9 = sst [smem:[#allocation2]] %s1397_s3 }
   0x2 LB: > { %s935_s18 = sadd.s32 4294967295, %s1011_s17   ;;  %p939_p0 = scmp.ge.s32.totalorder %s1011_s17, 1  ;;  %s1011_s17 = sphi %s1042_s17, %s15_s17  }
   0x3   : > { %p164_p1 = scmp.lt.s32.totalorder %s1011_s17, 3 }
   0x5   : > { %p165_p2 = pnand %p939_p0, %p164_p1 }
   0x6   : > { %v237_v0 = vld [vmem:[%s1395_s1 + $0x8] sm:$0xff] (!%p165_p2)  ;;  %v239_v1 = vld [vmem:[%s1395_s1 + $0x18] sm:$0xff] (!%p165_p2)  ;;  %v236_v2 = vld [vmem:[%s1395_s1] sm:$0xff] (!%p165_p2)  ;;  %s940_s24 = sshll.u32 (!%p165_p2), %s935_s18, 5  ;;  %v1013_v7 = vmov (!%p165_p2), 0.0   ;;  %vm355_vm0 = vcmask (!%p165_p2), 1043456   ;;  %v248_v47 = vlaneseq (!%p165_p2) }
   0x7   : > { %168 = sbr.rel (%p165_p2) target bundleno = 299 (0x12b), region = 36  ;;  %v982_v3 = vpack.c.bf16 (!%p165_p2), %v239_v1, %v237_v0  ;;  %v238_v4 = vld [vmem:[%s1395_s1 + $0x10] sm:$0xff] (!%p165_p2)  ;;  %v241_v5 = vld [vmem:[%s1395_s1 + $0x28] sm:$0xff] (!%p165_p2)  ;;  %v243_v6 = vld [vmem:[%s1395_s1 + $0x38] sm:$0xff] (!%p165_p2)  ;;  %426 = vmatprep.mubr.f32.mxu0 (!%p165_p2), %v1013_v7  ;;  %522 = vmatprep.mubr.f32.mxu1 (!%p165_p2), %v1013_v7  ;;  %p192_p3 = scmp.lt.s32.totalorder (!%p165_p2), %s940_s24, 63  ;;  %vm258_vm1 = vcmask (!%p165_p2), 293888  }
   0x8   : > { %v984_v8 = vpack.c.bf16 (!%p165_p2), %v238_v4, %v236_v2  ;;  %v986_v9 = vpack.c.bf16 (!%p165_p2), %v243_v6, %v241_v5  ;;  %v240_v10 = vld [vmem:[%s1395_s1 + $0x20] sm:$0xff] (!%p165_p2)  ;;  %v242_v11 = vld [vmem:[%s1395_s1 + $0x30] sm:$0xff] (!%p165_p2)  ;;  %v245_v13 = vld [vmem:[%s1395_s1 + $0x48] sm:$0xf] (!%p165_p2)  ;;  %v249_v48 = vshrl.u32 (!%p165_p2), %v248_v47, 7  ;;  %s619_s18 = sld [smem:[#allocation2]] (!%p165_p2) }
   0x9   : > { %983 = vmatprep.subr.bf16.mxu0 (!%p165_p2), %v982_v3  ;;  %990 = vmatprep.subr.bf16.mxu1 (!%p165_p2), %v982_v3  ;;  %v988_v12 = vpack.c.bf16 (!%p165_p2), %v242_v11, %v240_v10  ;;  %v244_v14 = vld [vmem:[%s1395_s1 + $0x40] sm:$0xf] (!%p165_p2) }
   0xa   : > { %985 = vmatpush1.bf16.msra.mxu0 (!%p165_p2), %v984_v8  ;;  %993 = vmatpush1.bf16.msra.mxu1 (!%p165_p2), %v984_v8  ;;  %v250_v49 = vsub.s32 (!%p165_p2), 0, %v249_v48  ;;  %v246_v50 = vld [vmem:[%s1396_s2] sm:$0x3] (!%p165_p2)  ;;  %v254_v51 = vsub.s32 (!%p165_p2), 1, %v249_v48 }
   0xb   : > { %987 = vmatprep.subr.bf16.mxu0 (!%p165_p2), %v986_v9  ;;  %991 = vmatprep.subr.bf16.mxu1 (!%p165_p2), %v986_v9 }
   0xc   : > { %v1187_v52 = vrot.slane (!%p165_p2), %v246_v50, %v250_v49  ;;  %v1189_v53 = vrot.slane (!%p165_p2), %v246_v50, %v254_v51 }
   0xe   : > { %s1400_s24 = smov (!%p192_p3, %s940_s24), 63  ;;  %989 = vmatpush1.bf16.msra.mxu0 %v988_v12  ;;  %994 = vmatpush1.bf16.msra.mxu1 %v988_v12  ;;  %v1192_v55 = vstv %s619_s18 }
   0xf   : > { %s941_s9 = sshll.u32 %s1400_s24, 3  ;;  %945 = vmatprep.subr.msk.mxu0 %vm355_vm0, %v245_v13  ;;  %992 = vmatprep.subr.msk.mxu1 %vm355_vm0, %v245_v13  ;;  %s981_s3 = sshll.u32 %s1400_s24, 4 }
  0x10   : > { %s1085_s14 = scalar_lea.vmem %s1394_s0, %s941_s9  ;;  %s1201_s23 = scalar_lea.vmem %s1398_s4, %s981_s3 }
  0x11   : > { %v204_v15 = vld [vmem:[%s1085_s14] sm:$0xff]  ;;  %v205_v17 = vld [vmem:[%s1085_s14 + $0x8] sm:$0xff]  ;;  %v206_v19 = vld [vmem:[%s1085_s14 + $0x10] sm:$0xff] }
  0x12   : > { %v220_v16 = vld [vmem:[%s1085_s14 + $0x80] sm:$0xff]  ;;  %946 = vmatpush1.msk.msra.mxu0 %vm355_vm0, %v244_v14  ;;  %995 = vmatpush1.msk.msra.mxu1 %vm355_vm0, %v244_v14  ;;  %v221_v18 = vld [vmem:[%s1085_s14 + $0x88] sm:$0xff]  ;;  %v222_v20 = vld [vmem:[%s1085_s14 + $0x90] sm:$0xff] }
  0x13   : > { %947 = vmatmul.mubr.msk.f32.vlgmr.msra.gmra.mrb[0].mxu0 %vm258_vm1, %v204_v15  ;;  %963 = vmatmul.mubr.msk.f32.vlgmr.msra.gmra.mrb[0].mxu1 %vm258_vm1, %v220_v16  ;;  %v207_v21 = vld [vmem:[%s1085_s14 + $0x18] sm:$0xff]  ;;  %v208_v23 = vld [vmem:[%s1085_s14 + $0x20] sm:$0xff]  ;;  %v209_v25 = vld [vmem:[%s1085_s14 + $0x28] sm:$0xff] }
  0x14   : > { %432 = vmatprep.mubr.f32.mxu0 %v1013_v7  ;;  %528 = vmatprep.mubr.f32.mxu1 %v1013_v7  ;;  %v223_v22 = vld [vmem:[%s1085_s14 + $0x98] sm:$0xff]  ;;  %v224_v24 = vld [vmem:[%s1085_s14 + $0xa0] sm:$0xff]  ;;  %v225_v26 = vld [vmem:[%s1085_s14 + $0xa8] sm:$0xff] }
  0x15   : > { %v210_v27 = vld [vmem:[%s1085_s14 + $0x30] sm:$0xff]  ;;  %v211_v29 = vld [vmem:[%s1085_s14 + $0x38] sm:$0xff]  ;;  %v212_v31 = vld [vmem:[%s1085_s14 + $0x40] sm:$0xff] }
  0x16   : > { %v226_v28 = vld [vmem:[%s1085_s14 + $0xb0] sm:$0xff]  ;;  %v227_v30 = vld [vmem:[%s1085_s14 + $0xb8] sm:$0xff]  ;;  %v228_v32 = vld [vmem:[%s1085_s14 + $0xc0] sm:$0xff] }
  0x17   : > { %948 = vmatmul.mubr.msk.f32.gmra.mrb[2].mxu0 %vm258_vm1, %v205_v17  ;;  %964 = vmatmul.mubr.msk.f32.gmra.mrb[2].mxu1 %vm258_vm1, %v221_v18  ;;  %v213_v33 = vld [vmem:[%s1085_s14 + $0x48] sm:$0xff]  ;;  %v214_v35 = vld [vmem:[%s1085_s14 + $0x50] sm:$0xff]  ;;  %v215_v37 = vld [vmem:[%s1085_s14 + $0x58] sm:$0xff] }
  0x18   : > { %438 = vmatprep.mubr.f32.mxu0 %v1013_v7  ;;  %534 = vmatprep.mubr.f32.mxu1 %v1013_v7  ;;  %v229_v34 = vld [vmem:[%s1085_s14 + $0xc8] sm:$0xff]  ;;  %v230_v36 = vld [vmem:[%s1085_s14 + $0xd0] sm:$0xff]  ;;  %v231_v38 = vld [vmem:[%s1085_s14 + $0xd8] sm:$0xff] }
  0x19   : > { %v216_v39 = vld [vmem:[%s1085_s14 + $0x60] sm:$0xff]  ;;  %v217_v41 = vld [vmem:[%s1085_s14 + $0x68] sm:$0xff]  ;;  %v218_v43 = vld [vmem:[%s1085_s14 + $0x70] sm:$0xff] }
  0x1a   : > { %v232_v40 = vld [vmem:[%s1085_s14 + $0xe0] sm:$0xff]  ;;  %v233_v42 = vld [vmem:[%s1085_s14 + $0xe8] sm:$0xff]  ;;  %v234_v44 = vld [vmem:[%s1085_s14 + $0xf0] sm:$0xff] }
  0x1b   : > { %949 = vmatmul.mubr.msk.f32.gmra.mrb[4].mxu0 %vm258_vm1, %v206_v19  ;;  %965 = vmatmul.mubr.msk.f32.gmra.mrb[4].mxu1 %vm258_vm1, %v222_v20  ;;  %v219_v45 = vld [vmem:[%s1085_s14 + $0x78] sm:$0xff] }
  0x1c   : > { %444 = vmatprep.mubr.f32.mxu0 %v1013_v7  ;;  %540 = vmatprep.mubr.f32.mxu1 %v1013_v7  ;;  %v235_v46 = vld [vmem:[%s1085_s14 + $0xf8] sm:$0xff] }
  0x1f   : > { %950 = vmatmul.mubr.msk.f32.gmra.mrb[6].mxu0 %vm258_vm1, %v207_v21  ;;  %966 = vmatmul.mubr.msk.f32.gmra.mrb[6].mxu1 %vm258_vm1, %v223_v22 }
  0x20   : > { %450 = vmatprep.mubr.f32.mxu0 %v1013_v7  ;;  %546 = vmatprep.mubr.f32.mxu1 %v1013_v7 }
  0x23   : > { %951 = vmatmul.mubr.msk.f32.gmra.mrb[8].mxu0 %vm258_vm1, %v208_v23  ;;  %967 = vmatmul.mubr.msk.f32.gmra.mrb[8].mxu1 %vm258_vm1, %v224_v24 }
  0x24   : > { %456 = vmatprep.mubr.f32.mxu0 %v1013_v7  ;;  %552 = vmatprep.mubr.f32.mxu1 %v1013_v7 }
  0x27   : > { %952 = vmatmul.mubr.msk.f32.gmra.mrb[10].mxu0 %vm258_vm1, %v209_v25  ;;  %968 = vmatmul.mubr.msk.f32.gmra.mrb[10].mxu1 %vm258_vm1, %v225_v26 }
  0x28   : > { %462 = vmatprep.mubr.f32.mxu0 %v1013_v7  ;;  %558 = vmatprep.mubr.f32.mxu1 %v1013_v7 }
  0x2b   : > { %953 = vmatmul.mubr.msk.f32.gmra.mrb[12].mxu0 %vm258_vm1, %v210_v27  ;;  %969 = vmatmul.mubr.msk.f32.gmra.mrb[12].mxu1 %vm258_vm1, %v226_v28 }
  0x2c   : > { %468 = vmatprep.mubr.f32.mxu0 %v1013_v7  ;;  %564 = vmatprep.mubr.f32.mxu1 %v1013_v7 }
  0x2f   : > { %954 = vmatmul.mubr.msk.f32.gmra.mrb[14].mxu0 %vm258_vm1, %v211_v29  ;;  %970 = vmatmul.mubr.msk.f32.gmra.mrb[14].mxu1 %vm258_vm1, %v227_v30 }
  0x30   : > { %474 = vmatprep.mubr.f32.mxu0 %v1013_v7  ;;  %570 = vmatprep.mubr.f32.mxu1 %v1013_v7 }
  0x33   : > { %955 = vmatmul.mubr.msk.f32.gmra.mrb[16].mxu0 %vm258_vm1, %v212_v31  ;;  %971 = vmatmul.mubr.msk.f32.gmra.mrb[16].mxu1 %vm258_vm1, %v228_v32 }
  0x34   : > { %480 = vmatprep.mubr.f32.mxu0 %v1013_v7  ;;  %576 = vmatprep.mubr.f32.mxu1 %v1013_v7 }
  0x37   : > { %956 = vmatmul.mubr.msk.f32.gmra.mrb[18].mxu0 %vm258_vm1, %v213_v33  ;;  %972 = vmatmul.mubr.msk.f32.gmra.mrb[18].mxu1 %vm258_vm1, %v229_v34 }
  0x38   : > { %486 = vmatprep.mubr.f32.mxu0 %v1013_v7  ;;  %582 = vmatprep.mubr.f32.mxu1 %v1013_v7 }
  0x3b   : > { %957 = vmatmul.mubr.msk.f32.gmra.mrb[20].mxu0 %vm258_vm1, %v214_v35  ;;  %973 = vmatmul.mubr.msk.f32.gmra.mrb[20].mxu1 %vm258_vm1, %v230_v36 }
  0x3c   : > { %492 = vmatprep.mubr.f32.mxu0 %v1013_v7  ;;  %588 = vmatprep.mubr.f32.mxu1 %v1013_v7 }
  0x3f   : > { %958 = vmatmul.mubr.msk.f32.gmra.mrb[22].mxu0 %vm258_vm1, %v215_v37  ;;  %974 = vmatmul.mubr.msk.f32.gmra.mrb[22].mxu1 %vm258_vm1, %v231_v38 }
  0x40   : > { %498 = vmatprep.mubr.f32.mxu0 %v1013_v7  ;;  %594 = vmatprep.mubr.f32.mxu1 %v1013_v7 }
  0x43   : > { %959 = vmatmul.mubr.msk.f32.gmra.mrb[24].mxu0 %vm258_vm1, %v216_v39  ;;  %975 = vmatmul.mubr.msk.f32.gmra.mrb[24].mxu1 %vm258_vm1, %v232_v40 }
  0x44   : > { %504 = vmatprep.mubr.f32.mxu0 %v1013_v7  ;;  %600 = vmatprep.mubr.f32.mxu1 %v1013_v7 }
  0x47   : > { %960 = vmatmul.mubr.msk.f32.gmra.mrb[26].mxu0 %vm258_vm1, %v217_v41  ;;  %976 = vmatmul.mubr.msk.f32.gmra.mrb[26].mxu1 %vm258_vm1, %v233_v42 }
  0x48   : > { %510 = vmatprep.mubr.f32.mxu0 %v1013_v7  ;;  %606 = vmatprep.mubr.f32.mxu1 %v1013_v7 }
  0x4b   : > { %961 = vmatmul.mubr.msk.f32.gmra.mrb[28].mxu0 %vm258_vm1, %v218_v43  ;;  %977 = vmatmul.mubr.msk.f32.gmra.mrb[28].mxu1 %vm258_vm1, %v234_v44 }
  0x4c   : > { %516 = vmatprep.mubr.f32.mxu0 %v1013_v7  ;;  %612 = vmatprep.mubr.f32.mxu1 %v1013_v7 }
  0x4f   : > { %962 = vmatmul.mubr.msk.f32.gmra.mrb[30].mxu0 %vm258_vm1, %v219_v45  ;;  %978 = vmatmul.mubr.msk.f32.gmra.mrb[30].mxu1 %vm258_vm1, %v235_v46 }
  0xe6   : > { %v428_v54 = vpop.f32.mrb[0].mxu0  ;;  %v524_v56 = vpop.f32.mrb[0].mxu1 }
  0xe7   : > { %v429_v57 = vadd.f32 %v428_v54, %v1187_v52  ;;  %v525_v58 = vadd.f32 %v524_v56, %v1187_v52  ;;  %v430_v59 = vpop.f32.mrb[1].mxu0  ;;  %v526_v60 = vpop.f32.mrb[1].mxu1 }
  0xe8   : > { %v431_v61 = vadd.f32 %v430_v59, %v1189_v53  ;;  %v527_v62 = vadd.f32 %v526_v60, %v1189_v53 }
  0xe9   : > { %vm620_vm2 = vcmp.ge.f32.partialorder %v429_v57, 0.0  ;;  %v685_v63 = vmul.f32 %v1192_v55, %v429_v57  ;;  %vm652_vm3 = vcmp.ge.f32.partialorder %v525_v58, 0.0  ;;  %v717_v0 = vmul.f32 %v1192_v55, %v525_v58 }
  0xea   : > { %vm621_vm4 = vcmp.ge.f32.partialorder %v431_v61, 0.0  ;;  %v686_v1 = vmul.f32 %v1192_v55, %v431_v61  ;;  %vm653_vm5 = vcmp.ge.f32.partialorder %v527_v62, 0.0  ;;  %v718_v2 = vmul.f32 %v1192_v55, %v527_v62  ;;  %v434_v3 = vpop.f32.mrb[2].mxu0  ;;  %v530_v4 = vpop.f32.mrb[2].mxu1 }
  0xeb   : > { %v749_v5 = vsel %vm620_vm2, %v429_v57, %v685_v63  ;;  %v781_v6 = vsel %vm652_vm3, %v525_v58, %v717_v0  ;;  %v435_v7 = vadd.f32 %v434_v3, %v1187_v52  ;;  %v531_v8 = vadd.f32 %v530_v4, %v1187_v52  ;;  %v436_v9 = vpop.f32.mrb[3].mxu0  ;;  %v532_v10 = vpop.f32.mrb[3].mxu1 }
  0xec   : > { %813 = vst [vmem:[%s1201_s23] sm:$0xff] %v749_v5  ;;  %845 = vst [vmem:[%s1201_s23 + $0x100] sm:$0xff] %v781_v6  ;;  %v750_v11 = vsel %vm621_vm4, %v431_v61, %v686_v1  ;;  %v782_v12 = vsel %vm653_vm5, %v527_v62, %v718_v2  ;;  %v437_v13 = vadd.f32 %v436_v9, %v1189_v53 }
  0xed   : > { %v533_v14 = vadd.f32 %v532_v10, %v1189_v53  ;;  %814 = vst [vmem:[%s1201_s23 + $0x8] sm:$0xff] %v750_v11  ;;  %846 = vst [vmem:[%s1201_s23 + $0x108] sm:$0xff] %v782_v12  ;;  %vm622_vm6 = vcmp.ge.f32.partialorder %v435_v7, 0.0  ;;  %v687_v15 = vmul.f32 %v1192_v55, %v435_v7  ;;  %vm654_vm7 = vcmp.ge.f32.partialorder %v531_v8, 0.0 }
  0xee   : > { %v719_v16 = vmul.f32 %v1192_v55, %v531_v8  ;;  %vm623_vm8 = vcmp.ge.f32.partialorder %v437_v13, 0.0  ;;  %v688_v17 = vmul.f32 %v1192_v55, %v437_v13  ;;  %v440_v19 = vpop.f32.mrb[4].mxu0  ;;  %v536_v20 = vpop.f32.mrb[4].mxu1 }
  0xef   : > { %vm655_vm9 = vcmp.ge.f32.partialorder %v533_v14, 0.0  ;;  %v720_v18 = vmul.f32 %v1192_v55, %v533_v14  ;;  %v751_v21 = vsel %vm622_vm6, %v435_v7, %v687_v15  ;;  %v441_v23 = vadd.f32 %v440_v19, %v1187_v52  ;;  %v442_v25 = vpop.f32.mrb[5].mxu0  ;;  %v538_v26 = vpop.f32.mrb[5].mxu1 }
  0xf0   : > { %v783_v22 = vsel %vm654_vm7, %v531_v8, %v719_v16  ;;  %v537_v24 = vadd.f32 %v536_v20, %v1187_v52  ;;  %815 = vst [vmem:[%s1201_s23 + $0x10] sm:$0xff] %v751_v21  ;;  %v752_v27 = vsel %vm623_vm8, %v437_v13, %v688_v17  ;;  %v443_v29 = vadd.f32 %v442_v25, %v1189_v53 }
  0xf1   : > { %847 = vst [vmem:[%s1201_s23 + $0x110] sm:$0xff] %v783_v22  ;;  %v784_v28 = vsel %vm655_vm9, %v533_v14, %v720_v18  ;;  %v539_v30 = vadd.f32 %v538_v26, %v1189_v53  ;;  %816 = vst [vmem:[%s1201_s23 + $0x18] sm:$0xff] %v752_v27  ;;  %vm624_vm10 = vcmp.ge.f32.partialorder %v441_v23, 0.0  ;;  %v689_v31 = vmul.f32 %v1192_v55, %v441_v23 }
  0xf2   : > { %848 = vst [vmem:[%s1201_s23 + $0x118] sm:$0xff] %v784_v28  ;;  %vm656_vm11 = vcmp.ge.f32.partialorder %v537_v24, 0.0  ;;  %v721_v32 = vmul.f32 %v1192_v55, %v537_v24  ;;  %vm625_vm12 = vcmp.ge.f32.partialorder %v443_v29, 0.0  ;;  %v690_v33 = vmul.f32 %v1192_v55, %v443_v29  ;;  %v446_v35 = vpop.f32.mrb[6].mxu0  ;;  %v542_v36 = vpop.f32.mrb[6].mxu1 }
  0xf3   : > { %vm657_vm13 = vcmp.ge.f32.partialorder %v539_v30, 0.0  ;;  %v722_v34 = vmul.f32 %v1192_v55, %v539_v30  ;;  %v753_v37 = vsel %vm624_vm10, %v441_v23, %v689_v31  ;;  %v447_v39 = vadd.f32 %v446_v35, %v1187_v52  ;;  %v448_v41 = vpop.f32.mrb[7].mxu0  ;;  %v544_v42 = vpop.f32.mrb[7].mxu1 }
  0xf4   : > { %v785_v38 = vsel %vm656_vm11, %v537_v24, %v721_v32  ;;  %v543_v40 = vadd.f32 %v542_v36, %v1187_v52  ;;  %817 = vst [vmem:[%s1201_s23 + $0x20] sm:$0xff] %v753_v37  ;;  %v754_v43 = vsel %vm625_vm12, %v443_v29, %v690_v33  ;;  %v449_v45 = vadd.f32 %v448_v41, %v1189_v53 }
  0xf5   : > { %849 = vst [vmem:[%s1201_s23 + $0x120] sm:$0xff] %v785_v38  ;;  %v786_v44 = vsel %vm657_vm13, %v539_v30, %v722_v34  ;;  %v545_v46 = vadd.f32 %v544_v42, %v1189_v53  ;;  %818 = vst [vmem:[%s1201_s23 + $0x28] sm:$0xff] %v754_v43  ;;  %vm626_vm14 = vcmp.ge.f32.partialorder %v447_v39, 0.0  ;;  %v691_v47 = vmul.f32 %v1192_v55, %v447_v39 }
  0xf6   : > { %850 = vst [vmem:[%s1201_s23 + $0x128] sm:$0xff] %v786_v44  ;;  %vm658_vm15 = vcmp.ge.f32.partialorder %v543_v40, 0.0  ;;  %v723_v48 = vmul.f32 %v1192_v55, %v543_v40  ;;  %vm627_vm0 = vcmp.ge.f32.partialorder %v449_v45, 0.0  ;;  %v692_v49 = vmul.f32 %v1192_v55, %v449_v45  ;;  %v452_v51 = vpop.f32.mrb[8].mxu0  ;;  %v548_v54 = vpop.f32.mrb[8].mxu1 }
  0xf7   : > { %vm659_vm1 = vcmp.ge.f32.partialorder %v545_v46, 0.0  ;;  %v724_v50 = vmul.f32 %v1192_v55, %v545_v46  ;;  %v755_v56 = vsel %vm626_vm14, %v447_v39, %v691_v47  ;;  %v453_v58 = vadd.f32 %v452_v51, %v1187_v52  ;;  %v454_v60 = vpop.f32.mrb[9].mxu0  ;;  %v550_v61 = vpop.f32.mrb[9].mxu1 }
  0xf8   : > { %v787_v57 = vsel %vm658_vm15, %v543_v40, %v723_v48  ;;  %v549_v59 = vadd.f32 %v548_v54, %v1187_v52  ;;  %819 = vst [vmem:[%s1201_s23 + $0x30] sm:$0xff] %v755_v56  ;;  %v756_v62 = vsel %vm627_vm0, %v449_v45, %v692_v49  ;;  %v455_v0 = vadd.f32 %v454_v60, %v1189_v53 }
  0xf9   : > { %851 = vst [vmem:[%s1201_s23 + $0x130] sm:$0xff] %v787_v57  ;;  %v788_v63 = vsel %vm659_vm1, %v545_v46, %v724_v50  ;;  %v551_v1 = vadd.f32 %v550_v61, %v1189_v53  ;;  %820 = vst [vmem:[%s1201_s23 + $0x38] sm:$0xff] %v756_v62  ;;  %vm628_vm2 = vcmp.ge.f32.partialorder %v453_v58, 0.0  ;;  %v693_v2 = vmul.f32 %v1192_v55, %v453_v58 }
  0xfa   : > { %852 = vst [vmem:[%s1201_s23 + $0x138] sm:$0xff] %v788_v63  ;;  %vm660_vm3 = vcmp.ge.f32.partialorder %v549_v59, 0.0  ;;  %v725_v3 = vmul.f32 %v1192_v55, %v549_v59  ;;  %vm629_vm4 = vcmp.ge.f32.partialorder %v455_v0, 0.0  ;;  %v694_v4 = vmul.f32 %v1192_v55, %v455_v0  ;;  %v458_v6 = vpop.f32.mrb[10].mxu0  ;;  %v554_v7 = vpop.f32.mrb[10].mxu1 }
  0xfb   : > { %vm661_vm5 = vcmp.ge.f32.partialorder %v551_v1, 0.0  ;;  %v726_v5 = vmul.f32 %v1192_v55, %v551_v1  ;;  %v757_v8 = vsel %vm628_vm2, %v453_v58, %v693_v2  ;;  %v459_v10 = vadd.f32 %v458_v6, %v1187_v52  ;;  %v460_v12 = vpop.f32.mrb[11].mxu0  ;;  %v556_v13 = vpop.f32.mrb[11].mxu1 }
  0xfc   : > { %v789_v9 = vsel %vm660_vm3, %v549_v59, %v725_v3  ;;  %v555_v11 = vadd.f32 %v554_v7, %v1187_v52  ;;  %821 = vst [vmem:[%s1201_s23 + $0x40] sm:$0xff] %v757_v8  ;;  %v758_v14 = vsel %vm629_vm4, %v455_v0, %v694_v4  ;;  %v461_v16 = vadd.f32 %v460_v12, %v1189_v53 }
  0xfd   : > { %853 = vst [vmem:[%s1201_s23 + $0x140] sm:$0xff] %v789_v9  ;;  %v790_v15 = vsel %vm661_vm5, %v551_v1, %v726_v5  ;;  %v557_v17 = vadd.f32 %v556_v13, %v1189_v53  ;;  %822 = vst [vmem:[%s1201_s23 + $0x48] sm:$0xff] %v758_v14  ;;  %vm630_vm6 = vcmp.ge.f32.partialorder %v459_v10, 0.0  ;;  %v695_v18 = vmul.f32 %v1192_v55, %v459_v10 }
  0xfe   : > { %854 = vst [vmem:[%s1201_s23 + $0x148] sm:$0xff] %v790_v15  ;;  %vm662_vm7 = vcmp.ge.f32.partialorder %v555_v11, 0.0  ;;  %v727_v19 = vmul.f32 %v1192_v55, %v555_v11  ;;  %vm631_vm8 = vcmp.ge.f32.partialorder %v461_v16, 0.0  ;;  %v696_v20 = vmul.f32 %v1192_v55, %v461_v16  ;;  %v464_v22 = vpop.f32.mrb[12].mxu0  ;;  %v560_v23 = vpop.f32.mrb[12].mxu1 }
  0xff   : > { %vm663_vm9 = vcmp.ge.f32.partialorder %v557_v17, 0.0  ;;  %v728_v21 = vmul.f32 %v1192_v55, %v557_v17  ;;  %v759_v24 = vsel %vm630_vm6, %v459_v10, %v695_v18  ;;  %v465_v26 = vadd.f32 %v464_v22, %v1187_v52  ;;  %v466_v28 = vpop.f32.mrb[13].mxu0  ;;  %v562_v29 = vpop.f32.mrb[13].mxu1 }
 0x100   : > { %v791_v25 = vsel %vm662_vm7, %v555_v11, %v727_v19  ;;  %v561_v27 = vadd.f32 %v560_v23, %v1187_v52  ;;  %823 = vst [vmem:[%s1201_s23 + $0x50] sm:$0xff] %v759_v24  ;;  %v760_v30 = vsel %vm631_vm8, %v461_v16, %v696_v20  ;;  %v467_v32 = vadd.f32 %v466_v28, %v1189_v53 }
 0x101   : > { %855 = vst [vmem:[%s1201_s23 + $0x150] sm:$0xff] %v791_v25  ;;  %v792_v31 = vsel %vm663_vm9, %v557_v17, %v728_v21  ;;  %v563_v33 = vadd.f32 %v562_v29, %v1189_v53  ;;  %824 = vst [vmem:[%s1201_s23 + $0x58] sm:$0xff] %v760_v30  ;;  %vm632_vm10 = vcmp.ge.f32.partialorder %v465_v26, 0.0  ;;  %v697_v34 = vmul.f32 %v1192_v55, %v465_v26 }
 0x102   : > { %856 = vst [vmem:[%s1201_s23 + $0x158] sm:$0xff] %v792_v31  ;;  %vm664_vm11 = vcmp.ge.f32.partialorder %v561_v27, 0.0  ;;  %v729_v35 = vmul.f32 %v1192_v55, %v561_v27  ;;  %vm633_vm12 = vcmp.ge.f32.partialorder %v467_v32, 0.0  ;;  %v698_v36 = vmul.f32 %v1192_v55, %v467_v32  ;;  %v470_v38 = vpop.f32.mrb[14].mxu0  ;;  %v566_v39 = vpop.f32.mrb[14].mxu1 }
 0x103   : > { %vm665_vm13 = vcmp.ge.f32.partialorder %v563_v33, 0.0  ;;  %v730_v37 = vmul.f32 %v1192_v55, %v563_v33  ;;  %v761_v40 = vsel %vm632_vm10, %v465_v26, %v697_v34  ;;  %v471_v42 = vadd.f32 %v470_v38, %v1187_v52  ;;  %v472_v44 = vpop.f32.mrb[15].mxu0  ;;  %v568_v45 = vpop.f32.mrb[15].mxu1 }
 0x104   : > { %v793_v41 = vsel %vm664_vm11, %v561_v27, %v729_v35  ;;  %v567_v43 = vadd.f32 %v566_v39, %v1187_v52  ;;  %825 = vst [vmem:[%s1201_s23 + $0x60] sm:$0xff] %v761_v40  ;;  %v762_v46 = vsel %vm633_vm12, %v467_v32, %v698_v36  ;;  %v473_v48 = vadd.f32 %v472_v44, %v1189_v53 }
 0x105   : > { %857 = vst [vmem:[%s1201_s23 + $0x160] sm:$0xff] %v793_v41  ;;  %v794_v47 = vsel %vm665_vm13, %v563_v33, %v730_v37  ;;  %v569_v49 = vadd.f32 %v568_v45, %v1189_v53  ;;  %826 = vst [vmem:[%s1201_s23 + $0x68] sm:$0xff] %v762_v46  ;;  %vm634_vm14 = vcmp.ge.f32.partialorder %v471_v42, 0.0  ;;  %v699_v50 = vmul.f32 %v1192_v55, %v471_v42 }
 0x106   : > { %858 = vst [vmem:[%s1201_s23 + $0x168] sm:$0xff] %v794_v47  ;;  %vm666_vm15 = vcmp.ge.f32.partialorder %v567_v43, 0.0  ;;  %v731_v51 = vmul.f32 %v1192_v55, %v567_v43  ;;  %vm635_vm0 = vcmp.ge.f32.partialorder %v473_v48, 0.0  ;;  %v700_v54 = vmul.f32 %v1192_v55, %v473_v48  ;;  %v476_v57 = vpop.f32.mrb[16].mxu0  ;;  %v572_v58 = vpop.f32.mrb[16].mxu1 }
 0x107   : > { %vm667_vm1 = vcmp.ge.f32.partialorder %v569_v49, 0.0  ;;  %v732_v56 = vmul.f32 %v1192_v55, %v569_v49  ;;  %v763_v59 = vsel %vm634_vm14, %v471_v42, %v699_v50  ;;  %v477_v61 = vadd.f32 %v476_v57, %v1187_v52  ;;  %v478_v63 = vpop.f32.mrb[17].mxu0  ;;  %v574_v0 = vpop.f32.mrb[17].mxu1 }
 0x108   : > { %v795_v60 = vsel %vm666_vm15, %v567_v43, %v731_v51  ;;  %v573_v62 = vadd.f32 %v572_v58, %v1187_v52  ;;  %827 = vst [vmem:[%s1201_s23 + $0x70] sm:$0xff] %v763_v59  ;;  %v764_v1 = vsel %vm635_vm0, %v473_v48, %v700_v54  ;;  %v479_v3 = vadd.f32 %v478_v63, %v1189_v53 }
 0x109   : > { %859 = vst [vmem:[%s1201_s23 + $0x170] sm:$0xff] %v795_v60  ;;  %v796_v2 = vsel %vm667_vm1, %v569_v49, %v732_v56  ;;  %v575_v4 = vadd.f32 %v574_v0, %v1189_v53  ;;  %828 = vst [vmem:[%s1201_s23 + $0x78] sm:$0xff] %v764_v1  ;;  %vm636_vm2 = vcmp.ge.f32.partialorder %v477_v61, 0.0  ;;  %v701_v5 = vmul.f32 %v1192_v55, %v477_v61 }
 0x10a   : > { %860 = vst [vmem:[%s1201_s23 + $0x178] sm:$0xff] %v796_v2  ;;  %vm668_vm3 = vcmp.ge.f32.partialorder %v573_v62, 0.0  ;;  %v733_v6 = vmul.f32 %v1192_v55, %v573_v62  ;;  %vm637_vm4 = vcmp.ge.f32.partialorder %v479_v3, 0.0  ;;  %v702_v7 = vmul.f32 %v1192_v55, %v479_v3  ;;  %v482_v9 = vpop.f32.mrb[18].mxu0  ;;  %v578_v10 = vpop.f32.mrb[18].mxu1 }
 0x10b   : > { %vm669_vm5 = vcmp.ge.f32.partialorder %v575_v4, 0.0  ;;  %v734_v8 = vmul.f32 %v1192_v55, %v575_v4  ;;  %v765_v11 = vsel %vm636_vm2, %v477_v61, %v701_v5  ;;  %v483_v13 = vadd.f32 %v482_v9, %v1187_v52  ;;  %v484_v15 = vpop.f32.mrb[19].mxu0  ;;  %v580_v16 = vpop.f32.mrb[19].mxu1 }
 0x10c   : > { %v797_v12 = vsel %vm668_vm3, %v573_v62, %v733_v6  ;;  %v579_v14 = vadd.f32 %v578_v10, %v1187_v52  ;;  %829 = vst [vmem:[%s1201_s23 + $0x80] sm:$0xff] %v765_v11  ;;  %v766_v17 = vsel %vm637_vm4, %v479_v3, %v702_v7  ;;  %v485_v19 = vadd.f32 %v484_v15, %v1189_v53 }
 0x10d   : > { %861 = vst [vmem:[%s1201_s23 + $0x180] sm:$0xff] %v797_v12  ;;  %v798_v18 = vsel %vm669_vm5, %v575_v4, %v734_v8  ;;  %v581_v20 = vadd.f32 %v580_v16, %v1189_v53  ;;  %830 = vst [vmem:[%s1201_s23 + $0x88] sm:$0xff] %v766_v17  ;;  %vm638_vm6 = vcmp.ge.f32.partialorder %v483_v13, 0.0  ;;  %v703_v21 = vmul.f32 %v1192_v55, %v483_v13 }
 0x10e   : > { %862 = vst [vmem:[%s1201_s23 + $0x188] sm:$0xff] %v798_v18  ;;  %vm670_vm7 = vcmp.ge.f32.partialorder %v579_v14, 0.0  ;;  %v735_v22 = vmul.f32 %v1192_v55, %v579_v14  ;;  %vm639_vm8 = vcmp.ge.f32.partialorder %v485_v19, 0.0  ;;  %v704_v23 = vmul.f32 %v1192_v55, %v485_v19  ;;  %v488_v25 = vpop.f32.mrb[20].mxu0  ;;  %v584_v26 = vpop.f32.mrb[20].mxu1 }
 0x10f   : > { %vm671_vm9 = vcmp.ge.f32.partialorder %v581_v20, 0.0  ;;  %v736_v24 = vmul.f32 %v1192_v55, %v581_v20  ;;  %v767_v27 = vsel %vm638_vm6, %v483_v13, %v703_v21  ;;  %v489_v29 = vadd.f32 %v488_v25, %v1187_v52  ;;  %v490_v31 = vpop.f32.mrb[21].mxu0  ;;  %v586_v32 = vpop.f32.mrb[21].mxu1 }
 0x110   : > { %v799_v28 = vsel %vm670_vm7, %v579_v14, %v735_v22  ;;  %v585_v30 = vadd.f32 %v584_v26, %v1187_v52  ;;  %831 = vst [vmem:[%s1201_s23 + $0x90] sm:$0xff] %v767_v27  ;;  %v768_v33 = vsel %vm639_vm8, %v485_v19, %v704_v23  ;;  %v491_v35 = vadd.f32 %v490_v31, %v1189_v53 }
 0x111   : > { %863 = vst [vmem:[%s1201_s23 + $0x190] sm:$0xff] %v799_v28  ;;  %v800_v34 = vsel %vm671_vm9, %v581_v20, %v736_v24  ;;  %v587_v36 = vadd.f32 %v586_v32, %v1189_v53  ;;  %832 = vst [vmem:[%s1201_s23 + $0x98] sm:$0xff] %v768_v33  ;;  %vm640_vm10 = vcmp.ge.f32.partialorder %v489_v29, 0.0  ;;  %v705_v37 = vmul.f32 %v1192_v55, %v489_v29 }
 0x112   : > { %864 = vst [vmem:[%s1201_s23 + $0x198] sm:$0xff] %v800_v34  ;;  %vm672_vm11 = vcmp.ge.f32.partialorder %v585_v30, 0.0  ;;  %v737_v38 = vmul.f32 %v1192_v55, %v585_v30  ;;  %vm641_vm12 = vcmp.ge.f32.partialorder %v491_v35, 0.0  ;;  %v706_v39 = vmul.f32 %v1192_v55, %v491_v35  ;;  %v494_v41 = vpop.f32.mrb[22].mxu0  ;;  %v590_v42 = vpop.f32.mrb[22].mxu1 }
 0x113   : > { %vm673_vm13 = vcmp.ge.f32.partialorder %v587_v36, 0.0  ;;  %v738_v40 = vmul.f32 %v1192_v55, %v587_v36  ;;  %v769_v43 = vsel %vm640_vm10, %v489_v29, %v705_v37  ;;  %v495_v45 = vadd.f32 %v494_v41, %v1187_v52  ;;  %v496_v47 = vpop.f32.mrb[23].mxu0  ;;  %v592_v48 = vpop.f32.mrb[23].mxu1 }
 0x114   : > { %v801_v44 = vsel %vm672_vm11, %v585_v30, %v737_v38  ;;  %v591_v46 = vadd.f32 %v590_v42, %v1187_v52  ;;  %833 = vst [vmem:[%s1201_s23 + $0xa0] sm:$0xff] %v769_v43  ;;  %v770_v49 = vsel %vm641_vm12, %v491_v35, %v706_v39  ;;  %v497_v51 = vadd.f32 %v496_v47, %v1189_v53 }
 0x115   : > { %865 = vst [vmem:[%s1201_s23 + $0x1a0] sm:$0xff] %v801_v44  ;;  %v802_v50 = vsel %vm673_vm13, %v587_v36, %v738_v40  ;;  %v593_v54 = vadd.f32 %v592_v48, %v1189_v53  ;;  %834 = vst [vmem:[%s1201_s23 + $0xa8] sm:$0xff] %v770_v49  ;;  %vm642_vm14 = vcmp.ge.f32.partialorder %v495_v45, 0.0  ;;  %v707_v56 = vmul.f32 %v1192_v55, %v495_v45 }
 0x116   : > { %866 = vst [vmem:[%s1201_s23 + $0x1a8] sm:$0xff] %v802_v50  ;;  %vm674_vm15 = vcmp.ge.f32.partialorder %v591_v46, 0.0  ;;  %v739_v57 = vmul.f32 %v1192_v55, %v591_v46  ;;  %vm643_vm0 = vcmp.ge.f32.partialorder %v497_v51, 0.0  ;;  %v708_v58 = vmul.f32 %v1192_v55, %v497_v51  ;;  %v500_v60 = vpop.f32.mrb[24].mxu0  ;;  %v596_v61 = vpop.f32.mrb[24].mxu1 }
 0x117   : > { %vm675_vm1 = vcmp.ge.f32.partialorder %v593_v54, 0.0  ;;  %v740_v59 = vmul.f32 %v1192_v55, %v593_v54  ;;  %v771_v62 = vsel %vm642_vm14, %v495_v45, %v707_v56  ;;  %v501_v0 = vadd.f32 %v500_v60, %v1187_v52  ;;  %v502_v2 = vpop.f32.mrb[25].mxu0  ;;  %v598_v3 = vpop.f32.mrb[25].mxu1 }
 0x118   : > { %v803_v63 = vsel %vm674_vm15, %v591_v46, %v739_v57  ;;  %v597_v1 = vadd.f32 %v596_v61, %v1187_v52  ;;  %835 = vst [vmem:[%s1201_s23 + $0xb0] sm:$0xff] %v771_v62  ;;  %v772_v4 = vsel %vm643_vm0, %v497_v51, %v708_v58  ;;  %v503_v6 = vadd.f32 %v502_v2, %v1189_v53 }
 0x119   : > { %867 = vst [vmem:[%s1201_s23 + $0x1b0] sm:$0xff] %v803_v63  ;;  %v804_v5 = vsel %vm675_vm1, %v593_v54, %v740_v59  ;;  %v599_v7 = vadd.f32 %v598_v3, %v1189_v53  ;;  %836 = vst [vmem:[%s1201_s23 + $0xb8] sm:$0xff] %v772_v4  ;;  %vm644_vm2 = vcmp.ge.f32.partialorder %v501_v0, 0.0  ;;  %v709_v8 = vmul.f32 %v1192_v55, %v501_v0 }
 0x11a   : > { %868 = vst [vmem:[%s1201_s23 + $0x1b8] sm:$0xff] %v804_v5  ;;  %vm676_vm3 = vcmp.ge.f32.partialorder %v597_v1, 0.0  ;;  %v741_v9 = vmul.f32 %v1192_v55, %v597_v1  ;;  %vm645_vm4 = vcmp.ge.f32.partialorder %v503_v6, 0.0  ;;  %v710_v10 = vmul.f32 %v1192_v55, %v503_v6  ;;  %v506_v12 = vpop.f32.mrb[26].mxu0  ;;  %v602_v13 = vpop.f32.mrb[26].mxu1 }
 0x11b   : > { %vm677_vm5 = vcmp.ge.f32.partialorder %v599_v7, 0.0  ;;  %v742_v11 = vmul.f32 %v1192_v55, %v599_v7  ;;  %v773_v14 = vsel %vm644_vm2, %v501_v0, %v709_v8  ;;  %v507_v16 = vadd.f32 %v506_v12, %v1187_v52  ;;  %v508_v18 = vpop.f32.mrb[27].mxu0  ;;  %v604_v19 = vpop.f32.mrb[27].mxu1 }
 0x11c   : > { %v805_v15 = vsel %vm676_vm3, %v597_v1, %v741_v9  ;;  %v603_v17 = vadd.f32 %v602_v13, %v1187_v52  ;;  %837 = vst [vmem:[%s1201_s23 + $0xc0] sm:$0xff] %v773_v14  ;;  %v774_v20 = vsel %vm645_vm4, %v503_v6, %v710_v10  ;;  %v509_v22 = vadd.f32 %v508_v18, %v1189_v53 }
 0x11d   : > { %869 = vst [vmem:[%s1201_s23 + $0x1c0] sm:$0xff] %v805_v15  ;;  %v806_v21 = vsel %vm677_vm5, %v599_v7, %v742_v11  ;;  %v605_v23 = vadd.f32 %v604_v19, %v1189_v53  ;;  %838 = vst [vmem:[%s1201_s23 + $0xc8] sm:$0xff] %v774_v20  ;;  %vm646_vm6 = vcmp.ge.f32.partialorder %v507_v16, 0.0  ;;  %v711_v24 = vmul.f32 %v1192_v55, %v507_v16 }
 0x11e   : > { %870 = vst [vmem:[%s1201_s23 + $0x1c8] sm:$0xff] %v806_v21  ;;  %vm678_vm7 = vcmp.ge.f32.partialorder %v603_v17, 0.0  ;;  %v743_v25 = vmul.f32 %v1192_v55, %v603_v17  ;;  %vm647_vm8 = vcmp.ge.f32.partialorder %v509_v22, 0.0  ;;  %v712_v26 = vmul.f32 %v1192_v55, %v509_v22  ;;  %v512_v28 = vpop.f32.mrb[28].mxu0  ;;  %v608_v29 = vpop.f32.mrb[28].mxu1 }
 0x11f   : > { %vm679_vm9 = vcmp.ge.f32.partialorder %v605_v23, 0.0  ;;  %v744_v27 = vmul.f32 %v1192_v55, %v605_v23  ;;  %v775_v30 = vsel %vm646_vm6, %v507_v16, %v711_v24  ;;  %v513_v32 = vadd.f32 %v512_v28, %v1187_v52  ;;  %v514_v34 = vpop.f32.mrb[29].mxu0  ;;  %v610_v35 = vpop.f32.mrb[29].mxu1 }
 0x120   : > { %v807_v31 = vsel %vm678_vm7, %v603_v17, %v743_v25  ;;  %v609_v33 = vadd.f32 %v608_v29, %v1187_v52  ;;  %839 = vst [vmem:[%s1201_s23 + $0xd0] sm:$0xff] %v775_v30  ;;  %v776_v36 = vsel %vm647_vm8, %v509_v22, %v712_v26  ;;  %v515_v38 = vadd.f32 %v514_v34, %v1189_v53 }
 0x121   : > { %871 = vst [vmem:[%s1201_s23 + $0x1d0] sm:$0xff] %v807_v31  ;;  %v808_v37 = vsel %vm679_vm9, %v605_v23, %v744_v27  ;;  %v611_v39 = vadd.f32 %v610_v35, %v1189_v53  ;;  %840 = vst [vmem:[%s1201_s23 + $0xd8] sm:$0xff] %v776_v36  ;;  %vm648_vm10 = vcmp.ge.f32.partialorder %v513_v32, 0.0  ;;  %v713_v40 = vmul.f32 %v1192_v55, %v513_v32 }
 0x122   : > { %872 = vst [vmem:[%s1201_s23 + $0x1d8] sm:$0xff] %v808_v37  ;;  %vm680_vm11 = vcmp.ge.f32.partialorder %v609_v33, 0.0  ;;  %v745_v41 = vmul.f32 %v1192_v55, %v609_v33  ;;  %vm649_vm12 = vcmp.ge.f32.partialorder %v515_v38, 0.0  ;;  %v714_v42 = vmul.f32 %v1192_v55, %v515_v38  ;;  %v518_v44 = vpop.f32.mrb[30].mxu0  ;;  %v614_v45 = vpop.f32.mrb[30].mxu1 }
 0x123   : > { %vm681_vm13 = vcmp.ge.f32.partialorder %v611_v39, 0.0  ;;  %v746_v43 = vmul.f32 %v1192_v55, %v611_v39  ;;  %v777_v46 = vsel %vm648_vm10, %v513_v32, %v713_v40  ;;  %v519_v48 = vadd.f32 %v518_v44, %v1187_v52  ;;  %v520_v50 = vpop.f32.mrb[31].mxu0  ;;  %v616_v51 = vpop.f32.mrb[31].mxu1 }
 0x124   : > { %v809_v47 = vsel %vm680_vm11, %v609_v33, %v745_v41  ;;  %v615_v49 = vadd.f32 %v614_v45, %v1187_v52  ;;  %841 = vst [vmem:[%s1201_s23 + $0xe0] sm:$0xff] %v777_v46  ;;  %v778_v54 = vsel %vm649_vm12, %v515_v38, %v714_v42  ;;  %v521_v57 = vadd.f32 %v520_v50, %v1189_v53 }
 0x125   : > { %873 = vst [vmem:[%s1201_s23 + $0x1e0] sm:$0xff] %v809_v47  ;;  %v810_v56 = vsel %vm681_vm13, %v611_v39, %v746_v43  ;;  %v617_v58 = vadd.f32 %v616_v51, %v1189_v53  ;;  %842 = vst [vmem:[%s1201_s23 + $0xe8] sm:$0xff] %v778_v54  ;;  %vm650_vm14 = vcmp.ge.f32.partialorder %v519_v48, 0.0  ;;  %v715_v59 = vmul.f32 %v1192_v55, %v519_v48 }
 0x126   : > { %874 = vst [vmem:[%s1201_s23 + $0x1e8] sm:$0xff] %v810_v56  ;;  %vm682_vm15 = vcmp.ge.f32.partialorder %v615_v49, 0.0  ;;  %v747_v52 = vmul.f32 %v1192_v55, %v615_v49  ;;  %vm651_vm0 = vcmp.ge.f32.partialorder %v521_v57, 0.0  ;;  %v716_v60 = vmul.f32 %v1192_v55, %v521_v57 }
 0x127   : > { %vm683_vm1 = vcmp.ge.f32.partialorder %v617_v58, 0.0  ;;  %v748_v61 = vmul.f32 %v1192_v55, %v617_v58  ;;  %v779_v62 = vsel %vm650_vm14, %v519_v48, %v715_v59 }
 0x128   : > { %v811_v63 = vsel %vm682_vm15, %v615_v49, %v747_v52  ;;  %843 = vst [vmem:[%s1201_s23 + $0xf0] sm:$0xff] %v779_v62  ;;  %v780_v53 = vsel %vm651_vm0, %v521_v57, %v716_v60 }
 0x129   : > { %875 = vst [vmem:[%s1201_s23 + $0x1f0] sm:$0xff] %v811_v63  ;;  %v812_v0 = vsel %vm683_vm1, %v617_v58, %v748_v61  ;;  %844 = vst [vmem:[%s1201_s23 + $0xf8] sm:$0xff] %v780_v53 }
 0x12a   : > { %876 = vst [vmem:[%s1201_s23 + $0x1f8] sm:$0xff] %v812_v0 }
 0x12b PF: > { %s15_s17 = sadd.s32 1, %s1011_s17  }
 0x12c   : > { %p12_p4 = scmp.ge.s32.totalorder %s15_s17, 4  }
 0x12e   :  { %14 = sbr.rel (!%p12_p4) target bundleno = 2 (0x2), region = 66 }

</bundles_post_ra>
